<compile_context>
chip_gen: v7x
topology: tpu7x:2x2x1
jax: 0.10.0
libtpu: 0.0.40
codegen_flags: <defaults>
</compile_context>

<pallas_src>
import functools

import jax
import jax.numpy as jnp
from jax.experimental import pallas as pl
from jax.experimental.pallas import tpu as pltpu


def _round_up(x, m):
    return (x + m - 1) // m * m


def _cdiv(a, b):
    return -(-a // b)


# --------------------------------------------------------------------------- #
# Kernels
# --------------------------------------------------------------------------- #
def _ffn_resident_kernel(x_ref, w1_ref, b1_ref, w2_ref, b2_ref, o_ref):
    # Weights fully VMEM-resident: one grid step per row tile, no accumulator.
    # x_ref: (tm, Dp) bf16   w1_ref: (Dp, Hp) bf16   b1_ref: (1, Hp) f32
    # w2_ref: (Hp, Dp) bf16  b2_ref: (1, Dp) f32     o_ref: (tm, Dp)
    h = jnp.dot(x_ref[...], w1_ref[...], preferred_element_type=jnp.float32)
    h = jnp.maximum(h + b1_ref[...], 0.0)
    o_ref[...] = (jnp.dot(h.astype(jnp.bfloat16), w2_ref[...],
                          preferred_element_type=jnp.float32)
                  + b2_ref[...]).astype(o_ref.dtype)


def _ffn_stream_kernel(x_ref, w1_ref, b1_ref, w2_ref, b2_ref, o_ref, acc_ref):
    # Hidden dim streamed in (Dp, th)/(th, Dp) weight tiles; f32 accumulator
    # resident across the k axis.
    # x_ref: (tm, Dp) bf16   w1_ref: (Dp, th) bf16   b1_ref: (1, th) f32
    # w2_ref: (th, Dp) bf16  b2_ref: (1, Dp) f32     o_ref/acc_ref: (tm, Dp)
    k = pl.program_id(1)
    nk = pl.num_programs(1)
    is_first = k == 0
    is_last = k == nk - 1
    not_first = jnp.logical_not(is_first)
    not_last = jnp.logical_not(is_last)

    h = jnp.dot(x_ref[...], w1_ref[...], preferred_element_type=jnp.float32)
    h = jnp.maximum(h + b1_ref[...], 0.0)
    partial = jnp.dot(h.astype(jnp.bfloat16), w2_ref[...],
                      preferred_element_type=jnp.float32)

    @pl.when(jnp.logical_and(is_first, not_last))
    def _():
        acc_ref[...] = partial                       # no zero-init + add

    @pl.when(jnp.logical_and(not_first, not_last))
    def _():
        acc_ref[...] += partial

    @pl.when(jnp.logical_and(is_last, not_first))
    def _():
        # Finalize directly: saves one (tm, Dp) f32 store + reload of acc_ref.
        o_ref[...] = (acc_ref[...] + partial + b2_ref[...]).astype(o_ref.dtype)

    @pl.when(jnp.logical_and(is_last, is_first))     # degenerate nk == 1
    def _():
        o_ref[...] = (partial + b2_ref[...]).astype(o_ref.dtype)


# --------------------------------------------------------------------------- #
# Tile / VMEM-budget selection (generation aware)
# --------------------------------------------------------------------------- #
def _vmem_budget_bytes():
    """~0.75x of this chip's per-core VMEM (128 MiB v5e/v6e, 64 MiB v7x)."""
    cap = 64 << 20  # conservative default (v7x per-TensorCore)
    try:
        info = pltpu.get_tpu_info()
        cap = int(getattr(info, "vmem_capacity_bytes", cap))
    except Exception:
        pass
    return max(int(0.75 * cap), 16 << 20)


def _choose_tiles(M, Dp, Hp, out_itemsize, budget):
    """Pick (resident, tm, th, footprint) so the double-buffered tiles fit VMEM."""
    bf, f4 = 2, 4

    def resident_fp(tm):
        return (2 * tm * Dp * bf            # x tile
                + 2 * Dp * Hp * bf          # W1 (resident; 2x = buffering headroom)
                + 2 * Hp * f4               # b1
                + 2 * Hp * Dp * bf          # W2
                + 2 * Dp * f4               # b2
                + 2 * tm * Dp * out_itemsize)   # out tile

    def stream_fp(tm, th):
        return (2 * tm * Dp * bf
                + 2 * Dp * th * bf + 2 * th * f4
                + 2 * th * Dp * bf + 2 * Dp * f4
                + 2 * tm * Dp * out_itemsize
                + tm * Dp * f4)             # f32 accumulator scratch

    # Row-tile candidates, largest first (tm sets arithmetic intensity; big tm
    # amortizes the ~0.35us/step grid overhead).  16 = bf16 sublane packing.
    tm_cands = [t for t in (1024, 768, 512, 384, 256, 128, 64, 32, 16)
                if t <= _round_up(M, 16)] or [16]
    # Give both v7x TensorCores a row tile when there is enough work
    # (harmless on single-core v5e/v6e).
    if M > 128:
        filtered = [t for t in tm_cands if _cdiv(M, t) >= 2]
        tm_cands = filtered or tm_cands

    # Fast path: weights fully VMEM-resident -> read from HBM exactly once.
    for tm in tm_cands:
        fp = resident_fp(tm)
        if fp <= budget:
            return True, tm, Hp, fp

    # Streaming path: keep tm as large as possible, shrink th before tm.
    th_cands = [t for t in (1024, 512, 256, 128) if Hp % t == 0]
    for tm in tm_cands:
        for th in th_cands:
            fp = stream_fp(tm, th)
            if fp <= budget:
                return False, tm, th, fp

    # Last resort: smallest tiles (may spill, but nothing smaller exists).
    tm, th = tm_cands[-1], th_cands[-1]
    return False, tm, th, stream_fp(tm, th)


# --------------------------------------------------------------------------- #
# pallas_call wrapper
# --------------------------------------------------------------------------- #
@functools.partial(jax.jit, static_argnames=("tm", "th", "resident", "vmem_limit"))
def _ffn_pallas(x, w1p, b1p, w2p, b2p, *, tm, th, resident, vmem_limit):
    B, T, D = x.shape
    Dp, Hp = w1p.shape
    M = B * T
    Mp = _round_up(M, tm)
    out_dtype = x.dtype

    x2 = x.reshape(M, D)
    if x2.dtype != jnp.bfloat16:
        x2 = x2.astype(jnp.bfloat16)
    if (Mp, Dp) != (M, D):                       # pad only when actually unaligned
        x2 = jnp.pad(x2, ((0, Mp - M), (0, Dp - D)))

    if resident:
        grid = (Mp // tm,)
        in_specs = [
            pl.BlockSpec((tm, Dp), lambda i: (i, 0)),   # x rows
            pl.BlockSpec((Dp, Hp), lambda i: (0, 0)),   # W1 (resident)
            pl.BlockSpec((1, Hp), lambda i: (0, 0)),    # b1
            pl.BlockSpec((Hp, Dp), lambda i: (0, 0)),   # W2 (resident)
            pl.BlockSpec((1, Dp), lambda i: (0, 0)),    # b2
        ]
        out_specs = pl.BlockSpec((tm, Dp), lambda i: (i, 0))
        scratch = []
        kernel = _ffn_resident_kernel
        dims = ("parallel",)
    else:
        grid = (Mp // tm, Hp // th)
        in_specs = [
            pl.BlockSpec((tm, Dp), lambda i, k: (i, 0)),   # x rows (reused over k)
            pl.BlockSpec((Dp, th), lambda i, k: (0, k)),   # W1 column-tile (streamed)
            pl.BlockSpec((1, th), lambda i, k: (0, k)),    # b1 chunk
            pl.BlockSpec((th, Dp), lambda i, k: (k, 0)),   # W2 row-tile (streamed)
            pl.BlockSpec((1, Dp), lambda i, k: (0, 0)),    # b2 (resident)
        ]
        out_specs = pl.BlockSpec((tm, Dp), lambda i, k: (i, 0))
        scratch = [pltpu.VMEM((tm, Dp), jnp.float32)]
        kernel = _ffn_stream_kernel
        dims = ("parallel", "arbitrary")

    out2 = pl.pallas_call(
        kernel,
        out_shape=jax.ShapeDtypeStruct((Mp, Dp), out_dtype),
        grid_spec=pltpu.PrefetchScalarGridSpec(
            num_scalar_prefetch=0,
            grid=grid,
            in_specs=in_specs,
            out_specs=out_specs,
            scratch_shapes=scratch,
        ),
        compiler_params=pltpu.CompilerParams(
            dimension_semantics=dims,
            vmem_limit_bytes=vmem_limit,
        ),
    )(x2, w1p, b1p, w2p, b2p)

    if (Mp, Dp) != (M, D):
        out2 = out2[:M, :D]
    return out2.reshape(B, T, D)


def prepare_ffn_params(w1, b1, w2, b2):
    """One-time weight prep (do at init, NOT per call): lane-dense 128-padding and
    bf16 cast of MXU operands; biases stay f32.  Zero padding is mathematically
    inert for this MLP."""
    D, H = w1.shape
    Dp, Hp = _round_up(D, 128), _round_up(H, 128)
    w1p = jnp.pad(w1.astype(jnp.bfloat16), ((0, Dp - D), (0, Hp - H)))
    b1p = jnp.pad(b1.reshape(1, H).astype(jnp.float32), ((0, 0), (0, Hp - H)))
    w2p = jnp.pad(w2.astype(jnp.bfloat16), ((0, Hp - H), (0, Dp - D)))
    b2p = jnp.pad(b2.reshape(1, D).astype(jnp.float32), ((0, 0), (0, Dp - D)))
    return {"w1": w1p, "b1": b1p, "w2": w2p, "b2": b2p}


def feed_forward(x, params):
    """Fused MLP forward: relu(x @ W1 + b1) @ W2 + b2.  x: (B, T, n_embed).
    `params` comes from prepare_ffn_params.  Dropout is inference identity."""
    w1p, b1p, w2p, b2p = params["w1"], params["b1"], params["w2"], params["b2"]
    B, T, D = x.shape
    M = B * T
    Dp, Hp = w1p.shape

    budget = _vmem_budget_bytes()
    resident, tm, th, fp = _choose_tiles(M, Dp, Hp, jnp.dtype(x.dtype).itemsize,
                                         budget)
    vmem_limit = int(min(max(2 * fp, 32 << 20), budget))

    return _ffn_pallas(x, w1p, b1p, w2p, b2p,
                       tm=tm, th=th, resident=resident, vmem_limit=vmem_limit)


def init_params(key, n_embed, dtype=jnp.float32):
    """Deterministic init mimicking torch.nn.Linear (uniform +-1/sqrt(fan_in))."""
    hidden = 4 * n_embed
    k1, k2, k3, k4 = jax.random.split(key, 4)
    lim1 = 1.0 / (n_embed ** 0.5)
    lim2 = 1.0 / (hidden ** 0.5)
    # Stored already transposed relative to PyTorch: (in_features, out_features).
    w1 = jax.random.uniform(k1, (n_embed, hidden), dtype, -lim1, lim1)
    b1 = jax.random.uniform(k2, (1, hidden), dtype, -lim1, lim1)
    w2 = jax.random.uniform(k3, (hidden, n_embed), dtype, -lim2, lim2)
    b2 = jax.random.uniform(k4, (1, n_embed), dtype, -lim2, lim2)
    return w1, b1, w2, b2


if __name__ == "__main__":
    key = jax.random.PRNGKey(0)
    kx, kp = jax.random.split(key)

    B, T, n_embed = 2, 8, 32          # small shapes; hidden = 4*n_embed = 128
    dropout = 0.1                      # inference-mode => identity

    x = jax.random.normal(kx, (B, T, n_embed), dtype=jnp.float32)
    w1, b1, w2, b2 = init_params(kp, n_embed)
    params = prepare_ffn_params(w1, b1, w2, b2)   # one-time prep (hoisted)

    out = feed_forward(x, params)
    out = jax.block_until_ready(out)

    # Reference with the same bf16 quantization of the MXU operands (f32 accumulate).
    xq = x.reshape(-1, n_embed).astype(jnp.bfloat16).astype(jnp.float32)
    w1q = w1.astype(jnp.bfloat16).astype(jnp.float32)
    w2q = w2.astype(jnp.bfloat16).astype(jnp.float32)
    h = jnp.maximum(xq @ w1q + b1, 0.0)
    hq = h.astype(jnp.bfloat16).astype(jnp.float32)
    ref = (hq @ w2q + b2).reshape(B, T, n_embed)

    assert out.shape == (B, T, n_embed)
    assert jnp.allclose(out, ref, atol=2e-3, rtol=2e-3), float(
        jnp.max(jnp.abs(out - ref)))

    print("KERNEL_OK")
</pallas_src>

<mosaic_0001>
module attributes {stable_mosaic.version = 11 : i64} {
  func.func @_ffn_resident_kernel(%arg0: i32, %arg1: memref<16x128xbf16, #tpu.memory_space<vmem>>, %arg2: memref<128x128xbf16, #tpu.memory_space<vmem>>, %arg3: memref<1x128xf32, #tpu.memory_space<vmem>>, %arg4: memref<128x128xbf16, #tpu.memory_space<vmem>>, %arg5: memref<1x128xf32, #tpu.memory_space<vmem>>, %arg6: memref<16x128xf32, #tpu.memory_space<vmem>>) attributes {dimension_semantics = [#tpu.dimension_semantics<parallel>], iteration_bounds = array<i64: 1>, scalar_prefetch = 0 : i64, scratch_operands = 0 : i64, tpu.core_type = #tpu.core_type<tc>, window_params = [{transform_indices = @transform_0, window_bounds = array<i64: 16, 128>}, {pipeline_mode = #tpu.pipeline_mode<synchronous>, transform_indices = @transform_1, window_bounds = array<i64: 128, 128>}, {pipeline_mode = #tpu.pipeline_mode<synchronous>, transform_indices = @transform_2, window_bounds = array<i64: 1, 128>}, {pipeline_mode = #tpu.pipeline_mode<synchronous>, transform_indices = @transform_3, window_bounds = array<i64: 128, 128>}, {pipeline_mode = #tpu.pipeline_mode<synchronous>, transform_indices = @transform_4, window_bounds = array<i64: 1, 128>}, {transform_indices = @transform_5, window_bounds = array<i64: 16, 128>}]} {
    %c0 = arith.constant 0 : index
    %c0_0 = arith.constant 0 : index
    %0 = vector.load %arg1[%c0, %c0_0] : memref<16x128xbf16, #tpu.memory_space<vmem>>, vector<16x128xbf16>
    %c0_1 = arith.constant 0 : index
    %c0_2 = arith.constant 0 : index
    %1 = vector.load %arg2[%c0_1, %c0_2] : memref<128x128xbf16, #tpu.memory_space<vmem>>, vector<128x128xbf16>
    %cst = arith.constant dense<0.000000e+00> : vector<16x128xf32>
    %2 = tpu.matmul %0, %1, %cst {dimension_numbers = #tpu.dot_dimension_numbers<[1], [0], [0], [1], [0, 0, 1, 1], [], []>} : vector<16x128xbf16>, vector<128x128xbf16>, vector<16x128xf32> -> vector<16x128xf32>
    %c0_3 = arith.constant 0 : index
    %c0_4 = arith.constant 0 : index
    %3 = vector.load %arg3[%c0_3, %c0_4] : memref<1x128xf32, #tpu.memory_space<vmem>>, vector<1x128xf32>
    %4 = vector.broadcast %3 : vector<1x128xf32> to vector<16x128xf32>
    %5 = arith.addf %2, %4 : vector<16x128xf32>
    %cst_5 = arith.constant 0.000000e+00 : f32
    %6 = vector.broadcast %cst_5 : f32 to vector<16x128xf32>
    %7 = arith.maximumf %5, %6 : vector<16x128xf32>
    %8 = arith.truncf %7 : vector<16x128xf32> to vector<16x128xbf16>
    %c0_6 = arith.constant 0 : index
    %c0_7 = arith.constant 0 : index
    %9 = vector.load %arg4[%c0_6, %c0_7] : memref<128x128xbf16, #tpu.memory_space<vmem>>, vector<128x128xbf16>
    %cst_8 = arith.constant dense<0.000000e+00> : vector<16x128xf32>
    %10 = tpu.matmul %8, %9, %cst_8 {dimension_numbers = #tpu.dot_dimension_numbers<[1], [0], [0], [1], [0, 0, 1, 1], [], []>} : vector<16x128xbf16>, vector<128x128xbf16>, vector<16x128xf32> -> vector<16x128xf32>
    %c0_9 = arith.constant 0 : index
    %c0_10 = arith.constant 0 : index
    %11 = vector.load %arg5[%c0_9, %c0_10] : memref<1x128xf32, #tpu.memory_space<vmem>>, vector<1x128xf32>
    %12 = vector.broadcast %11 : vector<1x128xf32> to vector<16x128xf32>
    %13 = arith.addf %10, %12 : vector<16x128xf32>
    %c0_11 = arith.constant 0 : index
    %c0_12 = arith.constant 0 : index
    %14 = vector.load %arg6[%c0_11, %c0_12] : memref<16x128xf32, #tpu.memory_space<vmem>>, vector<16x128xf32>
    tpu.vector_store %arg6[%c0_11, %c0_12], %13 {strides = array<i32>} : memref<16x128xf32, #tpu.memory_space<vmem>>, vector<16x128xf32>,
    return
  }
  func.func @transform_0(%arg0: i32) -> (i32, i32) {
    %c0_i32 = arith.constant 0 : i32
    %c0_i32_0 = arith.constant 0 : i32
    return %arg0, %c0_i32 : i32, i32
  }
  func.func @transform_1(%arg0: i32) -> (i32, i32) {
    %c0_i32 = arith.constant 0 : i32
    %c0_i32_0 = arith.constant 0 : i32
    %c0_i32_1 = arith.constant 0 : i32
    return %c0_i32, %c0_i32_0 : i32, i32
  }
  func.func @transform_2(%arg0: i32) -> (i32, i32) {
    %c0_i32 = arith.constant 0 : i32
    %c0_i32_0 = arith.constant 0 : i32
    %c0_i32_1 = arith.constant 0 : i32
    return %c0_i32, %c0_i32_0 : i32, i32
  }
  func.func @transform_3(%arg0: i32) -> (i32, i32) {
    %c0_i32 = arith.constant 0 : i32
    %c0_i32_0 = arith.constant 0 : i32
    %c0_i32_1 = arith.constant 0 : i32
    return %c0_i32, %c0_i32_0 : i32, i32
  }
  func.func @transform_4(%arg0: i32) -> (i32, i32) {
    %c0_i32 = arith.constant 0 : i32
    %c0_i32_0 = arith.constant 0 : i32
    %c0_i32_1 = arith.constant 0 : i32
    return %c0_i32, %c0_i32_0 : i32, i32
  }
  func.func @transform_5(%arg0: i32) -> (i32, i32) {
    %c0_i32 = arith.constant 0 : i32
    %c0_i32_0 = arith.constant 0 : i32
    return %arg0, %c0_i32 : i32, i32
  }
}

</mosaic_0001>

<bundles_post_ra>
// kernel: _ffn_pallas.1
= control target key start
LH: loop header
LB: loop body
LE: loop exit
PB: predicated region body
PF: predicated region fallthrough
CT: control target
= control target key end

     0   :  { %10 = vsyncpa [#allocation3], 0  ;;  %s515_s0 = inlined_call_operand.vmem [shape: bf16[16,128], index: 0, kind: input, shape index: {}]   ;;  %s516_s1 = inlined_call_operand.hbm [shape: bf16[128,128], index: 1, kind: input, shape index: {}]   ;;  %s517_s2 = inlined_call_operand.vmem [shape: f32[1,128], index: 2, kind: input, shape index: {}]   ;;  %s518_s3 = inlined_call_operand.hbm [shape: bf16[128,128], index: 3, kind: input, shape index: {}]   ;;  %s519_s4 = inlined_call_operand.vmem [shape: f32[1,128], index: 4, kind: input, shape index: {}]   ;;  %s520_s5 = inlined_call_operand.vmem [shape: f32[16,128], index: 5, kind: output, shape index: {}]  }
   0x1   :  { %11 = vsyncpa [#allocation5], 0  ;;  %s440_s18 = smov [#allocation2]   ;;  %s392_s22 = scalar_lea.hbm %s516_s1, 1024 }
   0x2   :  { %s19_s19 = sshll.u32 %s440_s18, 4  ;;  %p393_p0 = scmp.ne.s32.totalorder %s516_s1, %s392_s22  ;;  %s20_s19 = int_to_ptr.vmem [resolvable:$true] %s19_s19 }
   0x3   :  { %p396_p1 = scmp.lt.u32.totalorder %s392_s22, %s516_s1 }
   0x5   :  { %p398_p2 = pnand %p396_p1, %p393_p0 }
   0x7   :  { %401 = shalt.err (!%p398_p2)
}
   0x8   :  { %s402_s27 = scalar_lea.vmem %s20_s19, 1024  ;;  %p407_p4 = scmp.lt.s32.totalorder %s20_s19, %s20_s19 }
   0x9   :  { %p403_p3 = scmp.ne.s32.totalorder %s20_s19, %s402_s27  ;;  %p408_p5 = scmp.lt.s32.totalorder %s402_s27, %s402_s27 }
   0xb   :  { %p409_p6 = por %p408_p5, %p407_p4 }
   0xd   :  { %p410_p7 = pnand %p409_p6, %p403_p3 }
   0xf   :  { %413 = shalt.err (!%p410_p7)
}
  0x10   :  { %s441_s28 = smov 64   ;;  %s442_s29 = smov 4  }
  0x11   :  { %25 = dma.hbm_to_vmem [thread:$0]  %s516_s1, 1024, %s20_s19, [#allocation3], %s441_s28, %s441_s28, %s442_s29  }
  0x12   :  { %s443_s7 = smov [#allocation4]   ;;  %s414_s11 = scalar_lea.hbm %s518_s3, 1024 }
  0x13   :  { %s33_s8 = sshll.u32 %s443_s7, 4  ;;  %p415_p8 = scmp.ne.s32.totalorder %s518_s3, %s414_s11  ;;  %s34_s8 = int_to_ptr.vmem [resolvable:$true] %s33_s8 }
  0x14   :  { %p418_p9 = scmp.lt.u32.totalorder %s414_s11, %s518_s3 }
  0x16   :  { %p420_p10 = pnand %p418_p9, %p415_p8 }
  0x18   :  { %423 = shalt.err (!%p420_p10)
}
  0x19   :  { %s424_s16 = scalar_lea.vmem %s34_s8, 1024  ;;  %p429_p12 = scmp.lt.s32.totalorder %s34_s8, %s34_s8 }
  0x1a   :  { %p425_p11 = scmp.ne.s32.totalorder %s34_s8, %s424_s16  ;;  %p430_p13 = scmp.lt.s32.totalorder %s424_s16, %s424_s16 }
  0x1c   :  { %p431_p0 = por %p430_p13, %p429_p12 }
  0x1e   :  { %p432_p1 = pnand %p431_p0, %p425_p11 }
  0x20   :  { %435 = shalt.err (!%p432_p1)
}
  0x21   :  { %39 = dma.hbm_to_vmem [thread:$0]  %s518_s3, 1024, %s34_s8, [#allocation5], %s441_s28, %s441_s28, %s442_s29  }
  0x22   :  { %436 = dma.done.wait [#allocation3], 1024  }
  0x23   :  { %437 = vsyncadd [#allocation3], 4294966272 }
  0x24   :  { %438 = dma.done.wait [#allocation5], 1024  }
  0x25   :  { %439 = vsyncadd [#allocation5], 4294966272  ;;  %v444_v0 = vmov 0.0   ;;  %vm445_vm0 = vmmov 0   ;;  %v375_v1 = vld [vmem:[#allocation2] sm:$0xff]   ;;  %v376_v2 = vld [vmem:[#allocation2 + $0x8] sm:$0xff]  }
  0x26   :  { %329 = vmatprep.subr.bf16.mxu0 %v444_v0  ;;  %345 = vmatprep.mubr.msk.bf16.mxu0 %vm445_vm0, %v444_v0  ;;  %v377_v3 = vld [vmem:[#allocation2 + $0x10] sm:$0xff]   ;;  %v384_v4 = vld [vmem:[#allocation4] sm:$0xff]   ;;  %v378_v5 = vld [vmem:[#allocation2 + $0x18] sm:$0xff]  }
  0x27   :  { %349 = vmatprep.subr.bf16.mxu1 %v444_v0  ;;  %365 = vmatprep.mubr.msk.bf16.mxu1 %vm445_vm0, %v444_v0  ;;  %v385_v6 = vld [vmem:[#allocation4 + $0x8] sm:$0xff]   ;;  %v379_v7 = vld [vmem:[#allocation2 + $0x20] sm:$0xff]   ;;  %v386_v8 = vld [vmem:[#allocation4 + $0x10] sm:$0xff]  }
  0x28   :  { %330 = vmatpush3.bf16.msra.mxu0 %v375_v1  ;;  %350 = vmatpush3.bf16.msra.mxu1 %v384_v4  ;;  %v380_v9 = vld [vmem:[#allocation2 + $0x28] sm:$0xff]   ;;  %v387_v10 = vld [vmem:[#allocation4 + $0x18] sm:$0xff]   ;;  %v381_v11 = vld [vmem:[#allocation2 + $0x30] sm:$0xff]  }
  0x29   :  { %331 = vmatprep.subr.bf16.mxu0 %v444_v0  ;;  %351 = vmatprep.subr.bf16.mxu1 %v444_v0  ;;  %v388_v12 = vld [vmem:[#allocation4 + $0x20] sm:$0xff]   ;;  %v382_v13 = vld [vmem:[#allocation2 + $0x38] sm:$0xff]   ;;  %v389_v14 = vld [vmem:[#allocation4 + $0x28] sm:$0xff]  }
  0x2a   :  { %v383_v15 = vld [vmem:[%s515_s0] sm:$0xff]   ;;  %v390_v16 = vld [vmem:[#allocation4 + $0x30] sm:$0xff]   ;;  %v391_v17 = vld [vmem:[#allocation4 + $0x38] sm:$0xff]  }
  0x2b   :  { %v292_v18 = vld [vmem:[%s517_s2] ss:$0 sm:$0xff] }
  0x2c   :  { %332 = vmatpush3.bf16.msra.mxu0 %v376_v2  ;;  %352 = vmatpush3.bf16.msra.mxu1 %v385_v6  ;;  %v302_v28 = vld [vmem:[%s519_s4] ss:$0 sm:$0xff] }
  0x2d   :  { %333 = vmatprep.subr.bf16.mxu0 %v444_v0  ;;  %353 = vmatprep.subr.bf16.mxu1 %v444_v0 }
  0x30   :  { %334 = vmatpush3.bf16.msra.mxu0 %v377_v3  ;;  %354 = vmatpush3.bf16.msra.mxu1 %v386_v8 }
  0x31   :  { %335 = vmatprep.subr.bf16.mxu0 %v444_v0  ;;  %355 = vmatprep.subr.bf16.mxu1 %v444_v0 }
  0x34   :  { %336 = vmatpush3.bf16.msra.mxu0 %v378_v5  ;;  %356 = vmatpush3.bf16.msra.mxu1 %v387_v10 }
  0x35   :  { %337 = vmatprep.subr.bf16.mxu0 %v444_v0  ;;  %357 = vmatprep.subr.bf16.mxu1 %v444_v0 }
  0x38   :  { %338 = vmatpush3.bf16.msra.mxu0 %v379_v7  ;;  %358 = vmatpush3.bf16.msra.mxu1 %v388_v12 }
  0x39   :  { %339 = vmatprep.subr.bf16.mxu0 %v444_v0  ;;  %359 = vmatprep.subr.bf16.mxu1 %v444_v0 }
  0x3c   :  { %340 = vmatpush3.bf16.msra.mxu0 %v380_v9  ;;  %360 = vmatpush3.bf16.msra.mxu1 %v389_v14 }
  0x3d   :  { %341 = vmatprep.subr.bf16.mxu0 %v444_v0  ;;  %361 = vmatprep.subr.bf16.mxu1 %v444_v0 }
  0x40   :  { %342 = vmatpush3.bf16.msra.mxu0 %v381_v11  ;;  %362 = vmatpush3.bf16.msra.mxu1 %v390_v16 }
  0x41   :  { %343 = vmatprep.subr.bf16.mxu0 %v444_v0  ;;  %363 = vmatprep.subr.bf16.mxu1 %v444_v0 }
  0x44   :  { %344 = vmatpush3.bf16.msra.mxu0 %v382_v13  ;;  %364 = vmatpush3.bf16.msra.mxu1 %v391_v17 }
  0x47   :  { %346 = vmatmul.mubr.bf16.vlgmr.msra.gmra.mrb[0].mxu0 %v383_v15 }
 0x11a   :  { %v162_v19 = vpop.f32.mrb[0].mxu0 }
 0x11b   :  { %v163_v20 = vadd.f32 %v292_v18, %v162_v19  ;;  %v347_v21 = vpop.f32.mrb[1].mxu0 }
 0x11c   :  { %v165_v22 = vpop.f32.mrb[2].mxu0 }
 0x11d   :  { %v166_v23 = vadd.f32 %v292_v18, %v165_v22  ;;  %v348_v24 = vpop.f32.mrb[3].mxu0  ;;  %v169_v25 = vmax.f32 %v163_v20, 0.0 }
 0x11f   :  { %v170_v26 = vmax.f32 %v166_v23, 0.0 }
 0x121   :  { %v171_v27 = vpack.c.bf16 %v170_v26, %v169_v25 }
 0x123   :  { %366 = vmatmul.mubr.bf16.vlgmr.msra.gmra.mrb[0].mxu1 %v171_v27 }
 0x1f6   :  { %v277_v29 = vpop.f32.mrb[0].mxu1 }
 0x1f7   :  { %v278_v30 = vadd.f32 %v302_v28, %v277_v29  ;;  %v367_v31 = vpop.f32.mrb[1].mxu1 }
 0x1f8   :  { %v280_v32 = vpop.f32.mrb[2].mxu1 }
 0x1f9   :  { %284 = vst [vmem:[%s520_s5] sm:$0xff] %v278_v30  ;;  %v281_v33 = vadd.f32 %v302_v28, %v280_v32  ;;  %v368_v34 = vpop.f32.mrb[3].mxu1 }
 0x1fb   :  { %285 = vst [vmem:[%s520_s5 + $0x8] sm:$0xff] %v281_v33 }
 0x1fc   :  { %290 = vsyncpa [#allocation3], 1 }
 0x1fd   :  { %291 = vsyncpa [#allocation5], 1 }

</bundles_post_ra>
